<compile_context>
chip_gen: v5e
topology: v5e:2x2
jax: 0.10.0
libtpu: 0.0.40
codegen_flags: <defaults>
</compile_context>

<pallas_src>
import functools

import jax
import jax.numpy as jnp
from jax.experimental import pallas as pl
from jax.experimental.pallas import tpu as pltpu

BN_EPS = 1e-5


# --------------------------------------------------------------------------
# Kernels
# --------------------------------------------------------------------------
def adcnn_stats_kernel(w_ref, p_ref, sum_ref, sumsq_ref):
    # w: (C, K), p: (K, TM)  ->  per-channel partial sums over this M tile.
    y = jnp.dot(w_ref[...], p_ref[...],
                preferred_element_type=jnp.float32)            # (C, TM)
    sum_ref[0] = jnp.sum(y, axis=1, keepdims=True)             # (C, 1)
    sumsq_ref[0] = jnp.sum(y * y, axis=1, keepdims=True)       # (C, 1)


def adcnn_main_kernel(w_ref, affine_ref, p_ref, out_ref):
    # w: (C, K), affine: (C, 2) = [scale | shift], p: (K, TM), out: (C, TM)
    y = jnp.dot(w_ref[...], p_ref[...],
                preferred_element_type=jnp.float32)            # (C, TM)
    # Fused BatchNorm: one multiply-add per element.
    y = y * affine_ref[:, 0:1] + affine_ref[:, 1:2]
    # Softmax over channels (sublane axis); the divide goes to the EUP.
    m = jnp.max(y, axis=0, keepdims=True)                      # (1, TM)
    e = jnp.exp(y - m)
    denom = jnp.sum(e, axis=0, keepdims=True)                  # (1, TM)
    out_ref[...] = e * pl.reciprocal(denom, approx=True)


# --------------------------------------------------------------------------
# Wrapper glue
# --------------------------------------------------------------------------
def im2col_t(x, k, dilation):
    """x: (N, C_in, H, W) -> patches_T (C_in*k*k, N*H_out*W_out).

    Transposed so the big M dimension lands on the TPU lane axis.
    """
    n, c_in, h, w = x.shape
    pad = dilation
    h_out = h + 2 * pad - dilation * (k - 1)
    w_out = w + 2 * pad - dilation * (k - 1)
    xp = jnp.pad(x, ((0, 0), (0, 0), (pad, pad), (pad, pad)))
    cols = []
    for ki in range(k):
        for kj in range(k):
            cols.append(xp[:, :, ki * dilation:ki * dilation + h_out,
                              kj * dilation:kj * dilation + w_out])
    # (k*k, N, C_in, H_out, W_out) -> (C_in, k*k, N, H_out, W_out)
    p = jnp.transpose(jnp.stack(cols, axis=0), (2, 0, 1, 3, 4))
    return p.reshape(c_in * k * k, n * h_out * w_out), (n, h_out, w_out)


def _pick_m_tile(m):
    """Largest lane-aligned tile that divides M; prefer >=2 tiles so the
    'parallel' grid can be split across v7x's two TensorCores."""
    for t in (2048, 1024, 512, 256, 128):
        if m % t == 0 and m // t >= 2:
            return t
    for t in (2048, 1024, 512, 256, 128):
        if m % t == 0:
            return t
    return m  # single full-extent block (legal: block == full dim)


@functools.partial(jax.jit, static_argnames=("kernel_size", "dilation"))
def adcnn_forward(x, conv_w, gamma, beta, kernel_size, dilation):
    """x: (N, C_in, H, W); conv_w: (C_out, C_in, k, k) (PyTorch OIHW).
    Returns (N, 1, C_out, H_out*W_out), matching the PyTorch module."""
    k = kernel_size
    c_out = conv_w.shape[0]
    patches_t, (n, h_out, w_out) = im2col_t(x.astype(jnp.float32), k, dilation)
    k_dim, m_dim = patches_t.shape
    w_t = conv_w.reshape(c_out, k_dim).astype(jnp.float32)      # (C_out, K)

    tm = _pick_m_tile(m_dim)
    num_tiles = m_dim // tm

    # ---- pass 1: per-tile per-channel sum / sum-of-squares of y ----------
    stats_cost = pl.CostEstimate(
        flops=2 * m_dim * k_dim * c_out + 2 * m_dim * c_out,
        transcendentals=0,
        bytes_accessed=4 * (m_dim * k_dim + k_dim * c_out
                            + 2 * num_tiles * c_out))
    part_sum, part_sumsq = pl.pallas_call(
        adcnn_stats_kernel,
        out_shape=(jax.ShapeDtypeStruct((num_tiles, c_out, 1), jnp.float32),
                   jax.ShapeDtypeStruct((num_tiles, c_out, 1), jnp.float32)),
        grid=(num_tiles,),
        in_specs=[
            pl.BlockSpec((c_out, k_dim), lambda i: (0, 0)),
            pl.BlockSpec((k_dim, tm), lambda i: (0, i)),
        ],
        out_specs=(pl.BlockSpec((1, c_out, 1), lambda i: (i, 0, 0)),
                   pl.BlockSpec((1, c_out, 1), lambda i: (i, 0, 0))),
        compiler_params=pltpu.CompilerParams(
            dimension_semantics=("parallel",)),
        cost_estimate=stats_cost,
    )(w_t, patches_t)

    # ---- fold batch stats + gamma/beta into one fused affine (tiny) ------
    mean = jnp.sum(part_sum[:, :, 0], axis=0) / m_dim           # (C,)
    ex2 = jnp.sum(part_sumsq[:, :, 0], axis=0) / m_dim          # (C,)
    var = jnp.maximum(ex2 - mean * mean, 0.0)                   # guard E[y^2]-mean^2
    scale = gamma.astype(jnp.float32) * jax.lax.rsqrt(var + BN_EPS)
    shift = beta.astype(jnp.float32) - mean * scale
    affine = jnp.stack([scale, shift], axis=1)                  # (C, 2)

    # ---- pass 2: GEMM + fused BN + channel softmax, lane-dense output ----
    main_cost = pl.CostEstimate(
        flops=2 * m_dim * k_dim * c_out + 4 * m_dim * c_out,
        transcendentals=2 * m_dim * c_out,        # exp + approx reciprocal
        bytes_accessed=4 * (m_dim * k_dim + k_dim * c_out + 2 * c_out
                            + m_dim * c_out))
    out_t = pl.pallas_call(
        adcnn_main_kernel,
        out_shape=jax.ShapeDtypeStruct((c_out, m_dim), jnp.float32),
        grid=(num_tiles,),
        in_specs=[
            pl.BlockSpec((c_out, k_dim), lambda i: (0, 0)),
            pl.BlockSpec((c_out, 2), lambda i: (0, 0)),
            pl.BlockSpec((k_dim, tm), lambda i: (0, i)),
        ],
        out_specs=pl.BlockSpec((c_out, tm), lambda i: (0, i)),
        compiler_params=pltpu.CompilerParams(
            dimension_semantics=("parallel",)),
        cost_estimate=main_cost,
    )(w_t, affine, patches_t)

    # (C, M) -> (N, 1, C, H*W)   (M is n-major, then h, then w)
    sigma = out_t.reshape(c_out, n, h_out * w_out).transpose(1, 0, 2)
    return sigma[:, None, :, :]


# --------------------------------------------------------------------------
# Plain-JAX reference (mirrors the PyTorch module, training-mode BN)
# --------------------------------------------------------------------------
def reference_forward(x, conv_w, gamma, beta, dilation):
    y = jax.lax.conv_general_dilated(
        x.astype(jnp.float32), conv_w.astype(jnp.float32),
        window_strides=(1, 1), padding=[(dilation, dilation)] * 2,
        rhs_dilation=(dilation, dilation),
        dimension_numbers=("NCHW", "OIHW", "NCHW"),
        precision=jax.lax.Precision.HIGHEST)
    mean = jnp.mean(y, axis=(0, 2, 3), keepdims=True)
    var = jnp.mean((y - mean) ** 2, axis=(0, 2, 3), keepdims=True)
    y = (y - mean) * jax.lax.rsqrt(var + BN_EPS)
    y = y * gamma.reshape(1, -1, 1, 1) + beta.reshape(1, -1, 1, 1)
    y = jax.nn.softmax(y, axis=1)
    n, c, h, w = y.shape
    return y.reshape(n, 1, c, h * w)


if __name__ == "__main__":
    # Module config: ADCnn(in_channels=4, kernel_size=3, dilation=1, group=1)
    in_channels, kernel_size, dilation, group = 4, 3, 1, 1
    c_out = group * kernel_size * kernel_size      # 9

    key = jax.random.PRNGKey(0)
    kx, kw, kg, kb = jax.random.split(key, 4)

    x = jax.random.normal(kx, (2, in_channels, 16, 16), dtype=jnp.float32)
    conv_w = jax.random.normal(
        kw, (c_out, in_channels, kernel_size, kernel_size),
        dtype=jnp.float32) * 0.1
    gamma = 1.0 + 0.1 * jax.random.normal(kg, (c_out,), dtype=jnp.float32)
    beta = 0.1 * jax.random.normal(kb, (c_out,), dtype=jnp.float32)

    out = adcnn_forward(x, conv_w, gamma, beta, kernel_size, dilation)
    out = jax.block_until_ready(out)

    ref = reference_forward(x, conv_w, gamma, beta, dilation)
    assert out.shape == (2, 1, c_out, 16 * 16), out.shape
    assert jnp.allclose(out, ref, atol=2e-3, rtol=2e-3), float(
        jnp.max(jnp.abs(out - ref)))

    print("KERNEL_OK")
</pallas_src>

<mosaic_0001>
module attributes {stable_mosaic.version = 11 : i64} {
  func.func @adcnn_stats_kernel(%arg0: i32, %arg1: memref<9x36xf32, #tpu.memory_space<vmem>>, %arg2: memref<36x256xf32, #tpu.memory_space<vmem>>, %arg3: memref<1x9x1xf32, #tpu.memory_space<vmem>>, %arg4: memref<1x9x1xf32, #tpu.memory_space<vmem>>) attributes {dimension_semantics = [#tpu.dimension_semantics<parallel>], iteration_bounds = array<i64: 2>, scalar_prefetch = 0 : i64, scratch_operands = 0 : i64, tpu.core_type = #tpu.core_type<tc>, window_params = [{pipeline_mode = #tpu.pipeline_mode<synchronous>, transform_indices = @transform_0, window_bounds = array<i64: 9, 36>}, {transform_indices = @transform_1, window_bounds = array<i64: 36, 256>}, {transform_indices = @transform_2, window_bounds = array<i64: 1, 9, 1>}, {transform_indices = @transform_3, window_bounds = array<i64: 1, 9, 1>}]} {
    %c0 = arith.constant 0 : index
    %c0_0 = arith.constant 0 : index
    %0 = vector.load %arg1[%c0, %c0_0] : memref<9x36xf32, #tpu.memory_space<vmem>>, vector<9x36xf32>
    %c0_1 = arith.constant 0 : index
    %c0_2 = arith.constant 0 : index
    %1 = vector.load %arg2[%c0_1, %c0_2] : memref<36x256xf32, #tpu.memory_space<vmem>>, vector<36x256xf32>
    %cst = arith.constant dense<0.000000e+00> : vector<9x256xf32>
    %2 = tpu.matmul %0, %1, %cst {dimension_numbers = #tpu.dot_dimension_numbers<[1], [0], [0], [1], [0, 0, 1, 1], [], []>} : vector<9x36xf32>, vector<36x256xf32>, vector<9x256xf32> -> vector<9x256xf32>
    %cst_3 = arith.constant dense<0.000000e+00> : vector<9xf32>
    %3 = vector.multi_reduction <add>, %2, %cst_3 [1] : vector<9x256xf32> to vector<9xf32>
    %4 = vector.shape_cast %3 : vector<9xf32> to vector<9x1xf32>
    %c0_4 = arith.constant 0 : index
    %c0_5 = arith.constant 0 : index
    %c0_6 = arith.constant 0 : index
    %5 = vector.load %arg3[%c0_4, %c0_5, %c0_6] : memref<1x9x1xf32, #tpu.memory_space<vmem>>, vector<1x9x1xf32>
    %6 = vector.shape_cast %5 : vector<1x9x1xf32> to vector<9x1xf32>
    %7 = vector.shape_cast %4 : vector<9x1xf32> to vector<1x9x1xf32>
    tpu.vector_store %arg3[%c0_4, %c0_5, %c0_6], %7 {strides = array<i32>} : memref<1x9x1xf32, #tpu.memory_space<vmem>>, vector<1x9x1xf32>,
    %8 = arith.mulf %2, %2 : vector<9x256xf32>
    %cst_7 = arith.constant dense<0.000000e+00> : vector<9xf32>
    %9 = vector.multi_reduction <add>, %8, %cst_7 [1] : vector<9x256xf32> to vector<9xf32>
    %10 = vector.shape_cast %9 : vector<9xf32> to vector<9x1xf32>
    %c0_8 = arith.constant 0 : index
    %c0_9 = arith.constant 0 : index
    %c0_10 = arith.constant 0 : index
    %11 = vector.load %arg4[%c0_8, %c0_9, %c0_10] : memref<1x9x1xf32, #tpu.memory_space<vmem>>, vector<1x9x1xf32>
    %12 = vector.shape_cast %11 : vector<1x9x1xf32> to vector<9x1xf32>
    %13 = vector.shape_cast %10 : vector<9x1xf32> to vector<1x9x1xf32>
    tpu.vector_store %arg4[%c0_8, %c0_9, %c0_10], %13 {strides = array<i32>} : memref<1x9x1xf32, #tpu.memory_space<vmem>>, vector<1x9x1xf32>,
    return
  }
  func.func @transform_0(%arg0: i32) -> (i32, i32) {
    %c0_i32 = arith.constant 0 : i32
    %c0_i32_0 = arith.constant 0 : i32
    %c0_i32_1 = arith.constant 0 : i32
    return %c0_i32, %c0_i32_0 : i32, i32
  }
  func.func @transform_1(%arg0: i32) -> (i32, i32) {
    %c0_i32 = arith.constant 0 : i32
    %c0_i32_0 = arith.constant 0 : i32
    return %c0_i32, %arg0 : i32, i32
  }
  func.func @transform_2(%arg0: i32) -> (i32, i32, i32) {
    %c0_i32 = arith.constant 0 : i32
    %c0_i32_0 = arith.constant 0 : i32
    %c0_i32_1 = arith.constant 0 : i32
    return %arg0, %c0_i32, %c0_i32_0 : i32, i32, i32
  }
  func.func @transform_3(%arg0: i32) -> (i32, i32, i32) {
    %c0_i32 = arith.constant 0 : i32
    %c0_i32_0 = arith.constant 0 : i32
    %c0_i32_1 = arith.constant 0 : i32
    return %arg0, %c0_i32, %c0_i32_0 : i32, i32, i32
  }
}

module attributes {stable_mosaic.version = 11 : i64} {
  func.func @adcnn_main_kernel(%arg0: i32, %arg1: memref<9x36xf32, #tpu.memory_space<vmem>>, %arg2: memref<9x2xf32, #tpu.memory_space<vmem>>, %arg3: memref<36x256xf32, #tpu.memory_space<vmem>>, %arg4: memref<9x256xf32, #tpu.memory_space<vmem>>) attributes {dimension_semantics = [#tpu.dimension_semantics<parallel>], iteration_bounds = array<i64: 2>, scalar_prefetch = 0 : i64, scratch_operands = 0 : i64, tpu.core_type = #tpu.core_type<tc>, window_params = [{pipeline_mode = #tpu.pipeline_mode<synchronous>, transform_indices = @transform_0, window_bounds = array<i64: 9, 36>}, {pipeline_mode = #tpu.pipeline_mode<synchronous>, transform_indices = @transform_1, window_bounds = array<i64: 9, 2>}, {transform_indices = @transform_2, window_bounds = array<i64: 36, 256>}, {transform_indices = @transform_3, window_bounds = array<i64: 9, 256>}]} {
    %c0 = arith.constant 0 : index
    %c0_0 = arith.constant 0 : index
    %0 = vector.load %arg1[%c0, %c0_0] : memref<9x36xf32, #tpu.memory_space<vmem>>, vector<9x36xf32>
    %c0_1 = arith.constant 0 : index
    %c0_2 = arith.constant 0 : index
    %1 = vector.load %arg3[%c0_1, %c0_2] : memref<36x256xf32, #tpu.memory_space<vmem>>, vector<36x256xf32>
    %cst = arith.constant dense<0.000000e+00> : vector<9x256xf32>
    %2 = tpu.matmul %0, %1, %cst {dimension_numbers = #tpu.dot_dimension_numbers<[1], [0], [0], [1], [0, 0, 1, 1], [], []>} : vector<9x36xf32>, vector<36x256xf32>, vector<9x256xf32> -> vector<9x256xf32>
    %c0_3 = arith.constant 0 : index
    %c0_4 = arith.constant 0 : index
    %3 = vector.load %arg2[%c0_3, %c0_4] : memref<9x2xf32, #tpu.memory_space<vmem>>, vector<9x1xf32>
    %4 = vector.broadcast %3 : vector<9x1xf32> to vector<9x256xf32>
    %5 = arith.mulf %2, %4 : vector<9x256xf32>
    %c0_5 = arith.constant 0 : index
    %c1 = arith.constant 1 : index
    %6 = vector.load %arg2[%c0_5, %c1] : memref<9x2xf32, #tpu.memory_space<vmem>>, vector<9x1xf32>
    %7 = vector.broadcast %6 : vector<9x1xf32> to vector<9x256xf32>
    %8 = arith.addf %5, %7 : vector<9x256xf32>
    %cst_6 = arith.constant dense<0xFF800000> : vector<256xf32>
    %9 = vector.multi_reduction <maximumf>, %8, %cst_6 [0] : vector<9x256xf32> to vector<256xf32>
    %10 = vector.shape_cast %9 : vector<256xf32> to vector<1x256xf32>
    %11 = vector.broadcast %10 : vector<1x256xf32> to vector<9x256xf32>
    %12 = arith.subf %8, %11 : vector<9x256xf32>
    %13 = math.exp %12 : vector<9x256xf32>
    %cst_7 = arith.constant dense<0.000000e+00> : vector<256xf32>
    %14 = vector.multi_reduction <add>, %13, %cst_7 [0] : vector<9x256xf32> to vector<256xf32>
    %15 = vector.shape_cast %14 : vector<256xf32> to vector<1x256xf32>
    %16 = tpu.reciprocal %15 {approx = true} : vector<1x256xf32> -> vector<1x256xf32>
    %17 = vector.broadcast %16 : vector<1x256xf32> to vector<9x256xf32>
    %18 = arith.mulf %13, %17 : vector<9x256xf32>
    %c0_8 = arith.constant 0 : index
    %c0_9 = arith.constant 0 : index
    %19 = vector.load %arg4[%c0_8, %c0_9] : memref<9x256xf32, #tpu.memory_space<vmem>>, vector<9x256xf32>
    tpu.vector_store %arg4[%c0_8, %c0_9], %18 {strides = array<i32>} : memref<9x256xf32, #tpu.memory_space<vmem>>, vector<9x256xf32>,
    return
  }
  func.func @transform_0(%arg0: i32) -> (i32, i32) {
    %c0_i32 = arith.constant 0 : i32
    %c0_i32_0 = arith.constant 0 : i32
    %c0_i32_1 = arith.constant 0 : i32
    return %c0_i32, %c0_i32_0 : i32, i32
  }
  func.func @transform_1(%arg0: i32) -> (i32, i32) {
    %c0_i32 = arith.constant 0 : i32
    %c0_i32_0 = arith.constant 0 : i32
    %c0_i32_1 = arith.constant 0 : i32
    return %c0_i32, %c0_i32_0 : i32, i32
  }
  func.func @transform_2(%arg0: i32) -> (i32, i32) {
    %c0_i32 = arith.constant 0 : i32
    %c0_i32_0 = arith.constant 0 : i32
    return %c0_i32, %arg0 : i32, i32
  }
  func.func @transform_3(%arg0: i32) -> (i32, i32) {
    %c0_i32 = arith.constant 0 : i32
    %c0_i32_0 = arith.constant 0 : i32
    return %c0_i32, %arg0 : i32, i32
  }
}

</mosaic_0001>

<bundles_post_ra>
// kernel: adcnn_forward.2
= control target key start
LH: loop header
LB: loop body
LE: loop exit
PB: predicated region body
PF: predicated region fallthrough
CT: control target
= control target key end

     0   :  { %s518_s12 = smov 0   ;;  %s520_s13 = smov 0   ;;  %s581_s0 = inlined_call_operand.vmem [shape: f32[9,36], index: 0, kind: input, shape index: {}]   ;;  %s582_s1 = inlined_call_operand.vmem [shape: f32[36,512], index: 1, kind: input, shape index: {}]   ;;  %s583_s2 = inlined_call_operand.vmem [shape: f32[2,9,1], index: 2, kind: output, shape index: {0}]   ;;  %s584_s3 = inlined_call_operand.vmem [shape: f32[2,9,1], index: 3, kind: output, shape index: {1}]  }
   0x1   :  { %s522_s14 = smov 0  }
   0x2 LB: > { %s416_s15 = sadd.s32 4294967295, %s496_s14   ;;  %s535_s16 = sadd.s32 1, %s496_s14   ;;  %s496_s14 = sphi %s522_s14, %s587_s14   ;;  %s492_s13 = sphi %s520_s13, %s586_s13   ;;  %s488_s12 = sphi %s518_s12, %s585_s12  }
   0x3   : > { %s39_s17 = ssub.s32 %s496_s14, %s535_s16  ;;  %s42_s18 = sadd.s32 1, %s492_s13 }
   0x4   : > { %p40_p0 = scmp.eq.s32.totalorder %s39_s17, 0  ;;  %p49_p1 = scmp.ne.s32.totalorder %s492_s13, %s488_s12 }
   0x5   : > { %p50_p2 = scmp.eq.s32.totalorder %s496_s14, 0  ;;  %p419_p4 = scmp.ge.s32.totalorder %s496_s14, 2 }
   0x6   : > { %s544_s19 = scalar_select %p40_p0, %s492_s13, %s42_s18  }
   0x7   : > { %p51_p3 = por %p50_p2, %p49_p1  ;;  %130 = sbr.rel (%p419_p4) target bundleno = 26 (0x1a), region = 20 }
   0xc   : > { %133 = sbr.rel (!%p51_p3) target bundleno = 26 (0x1a), region = 24  ;;  %s135_s20 = sand.u32 (%p51_p3), 1, %s492_s13  }
   0xd   : > { %s435_s21 = sshll.u32 (%p51_p3), %s496_s14, 4  ;;  %s448_s22 = smul.u32 (%p51_p3), 80, %s135_s20 }
   0xe   : > { %s140_s25 = scalar_lea.vmem (%p51_p3), %s582_s1, %s435_s21 }
   0xf   : > { %v153_v0 = vld [vmem:[%s140_s25] sm:$0xff] (%p51_p3)  ;;  %v155_v1 = vld [vmem:[%s140_s25 + $0x8] sm:$0xff] (%p51_p3)  ;;  %s137_s26 = scalar_lea.vmem (%p51_p3), [#allocation2], %s448_s22 }
  0x10   : > { %v157_v2 = vld [vmem:[%s140_s25 + $0x20] sm:$0xff] (%p51_p3)  ;;  %154 = vst [vmem:[%s137_s26] sm:$0xff] (%p51_p3), %v153_v0  ;;  %v159_v3 = vld [vmem:[%s140_s25 + $0x28] sm:$0xff] (%p51_p3) }
  0x11   : > { %156 = vst [vmem:[%s137_s26 + $0x8] sm:$0xff] %v155_v1  ;;  %v161_v4 = vld [vmem:[%s140_s25 + $0x40] sm:$0xff]  ;;  %v163_v5 = vld [vmem:[%s140_s25 + $0x48] sm:$0xff] }
  0x12   : > { %158 = vst [vmem:[%s137_s26 + $0x10] sm:$0xff] %v157_v2  ;;  %v165_v6 = vld [vmem:[%s140_s25 + $0x60] sm:$0xff]  ;;  %v167_v7 = vld [vmem:[%s140_s25 + $0x68] sm:$0xff] }
  0x13   : > { %160 = vst [vmem:[%s137_s26 + $0x18] sm:$0xff] %v159_v3  ;;  %v169_v8 = vld [vmem:[%s140_s25 + $0x80] sm:$0xff]  ;;  %v171_v9 = vld [vmem:[%s140_s25 + $0x88] sm:$0xff] }
  0x14   : > { %162 = vst [vmem:[%s137_s26 + $0x20] sm:$0xff] %v161_v4 }
  0x15   : > { %164 = vst [vmem:[%s137_s26 + $0x28] sm:$0xff] %v163_v5 }
  0x16   : > { %166 = vst [vmem:[%s137_s26 + $0x30] sm:$0xff] %v165_v6 }
  0x17   : > { %168 = vst [vmem:[%s137_s26 + $0x38] sm:$0xff] %v167_v7 }
  0x18   : > { %170 = vst [vmem:[%s137_s26 + $0x40] sm:$0xff] %v169_v8 }
  0x19   : > { %172 = vst [vmem:[%s137_s26 + $0x48] sm:$0xff] %v171_v9 }
  0x1a PF: > { %p422_p5 = scmp.ge.s32.totalorder %s496_s14, 1  ;;  %p177_p6 = scmp.lt.s32.totalorder %s496_s14, 3 }
  0x1c   : > { %p178_p7 = pnand %p422_p5, %p177_p6 }
  0x1d   : > { %s184_s27 = sand.u32 (!%p178_p7), 1, %s488_s12   ;;  %p213_p8 = scmp.lt.s32.totalorder (!%p178_p7), %s416_s15, 1 }
  0x1e   : > { %181 = sbr.rel (%p178_p7) target bundleno = 301 (0x12d), region = 47 }
  0x1f   : > { %s449_s28 = smul.u32 (!%p178_p7), 80, %s184_s27 }
  0x21   : > { %s186_s29 = scalar_lea.vmem (!%p178_p7), [#allocation2], %s449_s28 }
  0x23   : > { %vm242_vm0 = vcmask 1043456   ;;  %v233_v10 = vld [vmem:[%s186_s29 + $0x40] sm:$0xf]  ;;  %v234_v11 = vld [vmem:[%s186_s29 + $0x48] sm:$0xf]  ;;  %v231_v12 = vld [vmem:[%s186_s29 + $0x30] sm:$0xff] }
  0x24   : > { %427 = vmatpush.msk.msra.mxu0 %vm242_vm0, %v233_v10  ;;  %430 = vmatpush.msk.msra.mxu1 %vm242_vm0, %v234_v11  ;;  %v232_v13 = vld [vmem:[%s186_s29 + $0x38] sm:$0xff]  ;;  %v229_v14 = vld [vmem:[%s186_s29 + $0x20] sm:$0xff]  ;;  %v230_v15 = vld [vmem:[%s186_s29 + $0x28] sm:$0xff]  ;;  %vm235_vm1 = vcmask 293888   ;;  %vm298_vm2 = vcmask 1040384   ;;  %s589_s15 = smov (!%p213_p8, %s416_s15), 1 }
  0x25   : > { %438 = vmatpush.msk.msra.mxu2 %vm242_vm0, %v233_v10  ;;  %443 = vmatpush.msk.msra.mxu3 %vm242_vm0, %v234_v11  ;;  %v227_v16 = vld [vmem:[%s186_s29 + $0x10] sm:$0xff]  ;;  %v228_v17 = vld [vmem:[%s186_s29 + $0x18] sm:$0xff]  ;;  %v225_v18 = vld [vmem:[%s186_s29] sm:$0xff]  ;;  %s436_s7 = sshll.u32 %s589_s15, 4  ;;  %vm304_vm3 = vcmask 7168   ;;  %vm306_vm4 = vcmask 0  }
  0x26   : > { %261 = vmatpush.msra.mxu0 %v231_v12  ;;  %284 = vmatpush.msra.mxu1 %v232_v13  ;;  %v226_v19 = vld [vmem:[%s186_s29 + $0x8] sm:$0xff]  ;;  %v223_v20 = vld [vmem:[%s581_s0] sm:$0xff]  ;;  %s217_s10 = scalar_lea.vmem %s583_s2, %s436_s7  ;;  %s222_s17 = scalar_lea.vmem %s584_s3, %s436_s7 }
  0x27   : > { %439 = vmatpush.msra.mxu2 %v231_v12  ;;  %444 = vmatpush.msra.mxu3 %v232_v13  ;;  %v224_v21 = vld [vmem:[%s581_s0 + $0x8] sm:$0x1] }
  0x28   : > { %262 = vmatpush.msra.mxu0 %v229_v14  ;;  %285 = vmatpush.msra.mxu1 %v230_v15 }
  0x29   : > { %440 = vmatpush.msra.mxu2 %v229_v14  ;;  %445 = vmatpush.msra.mxu3 %v230_v15 }
  0x2a   : > { %263 = vmatpush.msra.mxu0 %v227_v16  ;;  %286 = vmatpush.msra.mxu1 %v228_v17 }
  0x2b   : > { %441 = vmatpush.msra.mxu2 %v227_v16  ;;  %446 = vmatpush.msra.mxu3 %v228_v17 }
  0x2c   : > { %264 = vmatpush.msra.mxu0 %v225_v18  ;;  %287 = vmatpush.msra.mxu1 %v226_v19 }
  0x2d   : > { %442 = vmatpush.msra.mxu2 %v225_v18  ;;  %428 = vmatmul.msk.f32.vlgmr.msra.gmra.mxu0 %vm235_vm1, %v223_v20 }
  0x2e   : > { %447 = vmatpush.msra.mxu3 %v226_v19  ;;  %431 = vmatmul.msk.f32.vlgmr.msra.gmra.mxu1 %vm235_vm1, %v223_v20 }
  0x2f   : > { %429 = vmatmul.msk.f32.vlgmr.msra.gmra.mxu2 %vm235_vm1, %v224_v21  ;;  %432 = vmatmul.msk.f32.vlgmr.msra.gmra.mxu3 %vm235_vm1, %v224_v21 }
  0xaa   : > { %v266_v22 = vpop.f32.mrf.mxu0 }
  0xab   : > { %v308_v23 = vmul.f32 %v266_v22, %v266_v22  ;;  %v289_v24 = vpop.f32.mrf.mxu1 }
  0xac   : > { %v309_v25 = vmul.f32 %v289_v24, %v289_v24  ;;  %v295_v26 = vadd.f32 %v289_v24, %v266_v22 }
  0xae   : > { %296 = vadd.xlane.f32.xlu0 %v295_v26  ;;  %v312_v27 = vadd.f32 %v309_v25, %v308_v23 }
  0xb0   : > { %313 = vadd.xlane.f32.xlu1 %v312_v27 }
  0xb2   : > { %v269_v28 = vpop.f32.mrf.mxu2  ;;  %v292_v29 = vpop.f32.mrf.mxu3 }
  0xb3   : > { %v299_v30 = vsel %vm298_vm2, %v269_v28, 0.0  ;;  %v310_v31 = vmul.f32 %v269_v28, %v269_v28  ;;  %v300_v32 = vsel %vm298_vm2, %v292_v29, 0.0  ;;  %v311_v33 = vmul.f32 %v292_v29, %v292_v29 }
  0xb4   : > { %v301_v34 = vadd.f32 %v300_v32, %v299_v30 }
  0xb5   : > { %v315_v35 = vsel %vm298_vm2, %v310_v31, 0.0  ;;  %v316_v36 = vsel %vm298_vm2, %v311_v33, 0.0 }
  0xb6   : > { %302 = vadd.xlane.f32.xlu0 %v301_v34  ;;  %v317_v37 = vadd.f32 %v316_v36, %v315_v35 }
  0xb8   : > { %318 = vadd.xlane.f32.xlu1 %v317_v37 }
 0x121   : > { %v297_v38 = vpop.xlane.xlu0 %296 }
 0x122   : > { %305 = vst.msk [vmem:[%s217_s10] sm:$0xff] %vm304_vm3, %v297_v38 }
 0x123   : > { %v314_v39 = vpop.xlane.xlu1 %313 }
 0x124   : > { %320 = vst.msk [vmem:[%s222_s17] sm:$0xff] %vm304_vm3, %v314_v39 }
 0x129   : > { %v303_v40 = vpop.xlane.xlu0 %302 }
 0x12a   : > { %307 = vst.msk [vmem:[%s217_s10 + $0x8] sm:$0x1] %vm306_vm4, %v303_v40 }
 0x12b   : > { %v319_v41 = vpop.xlane.xlu1 %318 }
 0x12c   : > { %321 = vst.msk [vmem:[%s222_s17 + $0x8] sm:$0x1] %vm306_vm4, %v319_v41 }
 0x12d PF: > { %p11_p9 = scmp.ge.s32.totalorder %s535_s16, 4   ;;  %s585_s12 = smov %s492_s13 }
 0x12e   : > { %s586_s13 = smov %s544_s19  ;;  %s587_s14 = smov %s535_s16 }
 0x12f   :  { %13 = sbr.rel (!%p11_p9) target bundleno = 2 (0x2), region = 98 }

// kernel: adcnn_forward.3
= control target key start
LH: loop header
LB: loop body
LE: loop exit
PB: predicated region body
PF: predicated region fallthrough
CT: control target
= control target key end

     0   :  { %s569_s12 = smov 0   ;;  %s571_s13 = smov 0   ;;  %s649_s0 = inlined_call_operand.vmem [shape: f32[9,36], index: 0, kind: input, shape index: {}]   ;;  %s650_s1 = inlined_call_operand.vmem [shape: f32[9,2], index: 1, kind: input, shape index: {}]   ;;  %s651_s2 = inlined_call_operand.vmem [shape: f32[36,512], index: 2, kind: input, shape index: {}]   ;;  %s652_s3 = inlined_call_operand.vmem [shape: f32[9,512], index: 3, kind: output, shape index: {}]  }
   0x1   :  { %s573_s14 = smov 0  }
   0x2 LB: > { %s449_s15 = sadd.s32 4294967295, %s545_s14   ;;  %s586_s16 = sadd.s32 1, %s545_s14   ;;  %s545_s14 = sphi %s573_s14, %s656_s14   ;;  %s541_s13 = sphi %s571_s13, %s655_s13   ;;  %s537_s12 = sphi %s569_s12, %s654_s12  }
   0x3   : > { %s59_s17 = ssub.s32 %s545_s14, %s586_s16  ;;  %s62_s18 = sadd.s32 1, %s541_s13 }
   0x4   : > { %p60_p0 = scmp.eq.s32.totalorder %s59_s17, 0  ;;  %p69_p1 = scmp.ne.s32.totalorder %s541_s13, %s537_s12 }
   0x5   : > { %p70_p2 = scmp.eq.s32.totalorder %s545_s14, 0  ;;  %p99_p3 = scmp.eq.s32.totalorder %s449_s15, 1 }
   0x6   : > { %s597_s19 = scalar_select %p60_p0, %s541_s13, %s62_s18  }
   0x7   : > { %p71_p4 = por %p70_p2, %p69_p1  ;;  %p599_p5 = por %p99_p3, %p69_p1 }
   0x8   : > { %p452_p6 = scmp.ge.s32.totalorder %s545_s14, 2 }
   0xa   : > { %127 = sbr.rel (%p452_p6) target bundleno = 29 (0x1d), region = 24 }
   0xf   : > { %130 = sbr.rel (!%p71_p4) target bundleno = 29 (0x1d), region = 28  ;;  %s132_s21 = sand.u32 (%p71_p4), 1, %s541_s13  }
  0x10   : > { %s468_s22 = sshll.u32 (%p71_p4), %s545_s14, 4  ;;  %s480_s23 = smul.u32 (%p71_p4), 80, %s132_s21 }
  0x11   : > { %s137_s26 = scalar_lea.vmem (%p71_p4), %s651_s2, %s468_s22 }
  0x12   : > { %v150_v0 = vld [vmem:[%s137_s26] sm:$0xff] (%p71_p4)  ;;  %v152_v1 = vld [vmem:[%s137_s26 + $0x8] sm:$0xff] (%p71_p4)  ;;  %s134_s27 = scalar_lea.vmem (%p71_p4), [#allocation2], %s480_s23 }
  0x13   : > { %v154_v2 = vld [vmem:[%s137_s26 + $0x20] sm:$0xff] (%p71_p4)  ;;  %151 = vst [vmem:[%s134_s27] sm:$0xff] (%p71_p4), %v150_v0  ;;  %v156_v3 = vld [vmem:[%s137_s26 + $0x28] sm:$0xff] (%p71_p4) }
  0x14   : > { %153 = vst [vmem:[%s134_s27 + $0x8] sm:$0xff] %v152_v1  ;;  %v158_v4 = vld [vmem:[%s137_s26 + $0x40] sm:$0xff]  ;;  %v160_v5 = vld [vmem:[%s137_s26 + $0x48] sm:$0xff] }
  0x15   : > { %155 = vst [vmem:[%s134_s27 + $0x10] sm:$0xff] %v154_v2  ;;  %v162_v6 = vld [vmem:[%s137_s26 + $0x60] sm:$0xff]  ;;  %v164_v7 = vld [vmem:[%s137_s26 + $0x68] sm:$0xff] }
  0x16   : > { %157 = vst [vmem:[%s134_s27 + $0x18] sm:$0xff] %v156_v3  ;;  %v166_v8 = vld [vmem:[%s137_s26 + $0x80] sm:$0xff]  ;;  %v168_v9 = vld [vmem:[%s137_s26 + $0x88] sm:$0xff] }
  0x17   : > { %159 = vst [vmem:[%s134_s27 + $0x20] sm:$0xff] %v158_v4 }
  0x18   : > { %161 = vst [vmem:[%s134_s27 + $0x28] sm:$0xff] %v160_v5 }
  0x19   : > { %163 = vst [vmem:[%s134_s27 + $0x30] sm:$0xff] %v162_v6 }
  0x1a   : > { %165 = vst [vmem:[%s134_s27 + $0x38] sm:$0xff] %v164_v7 }
  0x1b   : > { %167 = vst [vmem:[%s134_s27 + $0x40] sm:$0xff] %v166_v8 }
  0x1c   : > { %169 = vst [vmem:[%s134_s27 + $0x48] sm:$0xff] %v168_v9 }
  0x1d PF: > { %p455_p7 = scmp.ge.s32.totalorder %s545_s14, 1  ;;  %p174_p8 = scmp.lt.s32.totalorder %s545_s14, 3 }
  0x1f   : > { %p175_p9 = pnand %p455_p7, %p174_p8 }
  0x20   : > { %s181_s28 = sand.u32 (!%p175_p9), 1, %s537_s12  }
  0x21   : > { %178 = sbr.rel (%p175_p9) target bundleno = 250 (0xfa), region = 51  ;;  %s456_s17 = sshll.u32 (!%p175_p9), %s181_s28, 5 }
  0x22   : > { %s481_s29 = smul.u32 (!%p175_p9), 80, %s181_s28  ;;  %s202_s18 = scalar_lea.vmem (!%p175_p9), [#allocation3], %s456_s17 }
  0x24   : > { %s183_s5 = scalar_lea.vmem (!%p175_p9), [#allocation2], %s481_s29 }
  0x26   : > { %v278_v10 = vld [vmem:[%s650_s1 + $0x8] sm:$0x1]  ;;  %vm224_vm0 = vcmask 1043456   ;;  %v547_v11 = vmov 0   ;;  %v548_v12 = vmov 1   ;;  %v213_v15 = vld [vmem:[%s183_s5 + $0x30] sm:$0xff] }
  0x27   : > { %508 = vset.pattern.permute.xlu0 %v547_v11  ;;  %509 = vset.pattern.permute.xlu1 %v548_v12  ;;  %v215_v13 = vld [vmem:[%s183_s5 + $0x40] sm:$0xf]  ;;  %v216_v14 = vld [vmem:[%s183_s5 + $0x48] sm:$0xf]  ;;  %v214_v16 = vld [vmem:[%s183_s5 + $0x38] sm:$0xff]  ;;  %vm217_vm1 = vcmask 293888  }
  0x28   : > { %286 = vperm.xlu0 %508, %v278_v10   ;;  %298 = vperm.xlu1 %509, %v278_v10   ;;  %v211_v17 = vld [vmem:[%s183_s5 + $0x20] sm:$0xff]  ;;  %v212_v18 = vld [vmem:[%s183_s5 + $0x28] sm:$0xff]  ;;  %v209_v19 = vld [vmem:[%s183_s5 + $0x10] sm:$0xff]  ;;  %vm305_vm2 = vcmask 1040384   ;;  %s469_s21 = sshll.u32 (%p599_p5), %s449_s15, 4 }
  0x29   : > { %457 = vmatpush.msk.msra.mxu0 %vm224_vm0, %v215_v13  ;;  %470 = vmatpush.msk.msra.mxu2 %vm224_vm0, %v215_v13  ;;  %v210_v20 = vld [vmem:[%s183_s5 + $0x18] sm:$0xff]  ;;  %v207_v21 = vld [vmem:[%s183_s5] sm:$0xff]  ;;  %v208_v22 = vld [vmem:[%s183_s5 + $0x8] sm:$0xff]  ;;  %s369_s23 = scalar_lea.vmem (%p599_p5), %s652_s3, %s469_s21 }
  0x2a   : > { %460 = vmatpush.msk.msra.mxu1 %vm224_vm0, %v216_v14  ;;  %475 = vmatpush.msk.msra.mxu3 %vm224_vm0, %v216_v14  ;;  %v205_v23 = vld [vmem:[%s649_s0] sm:$0xff]  ;;  %v206_v24 = vld [vmem:[%s649_s0 + $0x8] sm:$0x1] }
  0x2b   : > { %243 = vmatpush.msra.mxu0 %v213_v15  ;;  %471 = vmatpush.msra.mxu2 %v213_v15  ;;  %v277_v25 = vld [vmem:[%s650_s1] sm:$0xff] }
  0x2c   : > { %266 = vmatpush.msra.mxu1 %v214_v16  ;;  %476 = vmatpush.msra.mxu3 %v214_v16 }
  0x2d   : > { %244 = vmatpush.msra.mxu0 %v211_v17  ;;  %472 = vmatpush.msra.mxu2 %v211_v17 }
  0x2e   : > { %267 = vmatpush.msra.mxu1 %v212_v18  ;;  %477 = vmatpush.msra.mxu3 %v212_v18 }
  0x2f   : > { %245 = vmatpush.msra.mxu0 %v209_v19  ;;  %473 = vmatpush.msra.mxu2 %v209_v19 }
  0x30   : > { %268 = vmatpush.msra.mxu1 %v210_v20  ;;  %478 = vmatpush.msra.mxu3 %v210_v20 }
  0x31   : > { %246 = vmatpush.msra.mxu0 %v207_v21  ;;  %474 = vmatpush.msra.mxu2 %v207_v21 }
  0x32   : > { %269 = vmatpush.msra.mxu1 %v208_v22  ;;  %479 = vmatpush.msra.mxu3 %v208_v22 }
  0x33   : > { %458 = vmatmul.msk.f32.vlgmr.msra.gmra.mxu0 %vm217_vm1, %v205_v23  ;;  %459 = vmatmul.msk.f32.vlgmr.msra.gmra.mxu2 %vm217_vm1, %v206_v24 }
  0x34   : > { %461 = vmatmul.msk.f32.vlgmr.msra.gmra.mxu1 %vm217_vm1, %v205_v23  ;;  %462 = vmatmul.msk.f32.vlgmr.msra.gmra.mxu3 %vm217_vm1, %v206_v24 }
  0x35   : > { %281 = vperm.xlu0 %508, %v277_v25   ;;  %294 = vperm.xlu1 %509, %v277_v25  }
  0x3d   : > { %510 = vset.pattern.permute.xlu0 %v548_v12 }
  0x9a   : > { %v287_v26 = vpop.permute.xlu0 %286  ;;  %v299_v27 = vpop.permute.xlu1 %298 }
  0xa7   : > { %v282_v28 = vpop.permute.xlu0 %281  ;;  %v295_v34 = vpop.permute.xlu1 %294 }
  0xb0   : > { %v248_v29 = vpop.f32.mrf.mxu0 }
  0xb1   : > { %v271_v30 = vpop.f32.mrf.mxu1  ;;  %v289_v31 = vmul.f32 %v282_v28, %v248_v29 }
  0xb2   : > { %v290_v33 = vmul.f32 %v282_v28, %v271_v30 }
  0xb3   : > { %v301_v39 = vadd.f32 %v295_v34, %v289_v31 }
  0xb4   : > { %v302_v41 = vadd.f32 %v295_v34, %v290_v33 }
  0xb6   : > { %v251_v32 = vpop.f32.mrf.mxu2 }
  0xb7   : > { %v291_v35 = vmul.f32 %v287_v26, %v251_v32  ;;  %v274_v36 = vpop.f32.mrf.mxu3 }
  0xb8   : > { %v292_v37 = vmul.f32 %v287_v26, %v274_v36 }
  0xb9   : > { %v303_v38 = vadd.f32 %v299_v27, %v291_v35 }
  0xba   : > { %v304_v40 = vadd.f32 %v299_v27, %v292_v37 }
  0xbb   : > { %v306_v42 = vsel %vm305_vm2, %v303_v38, -inf }
  0xbc   : > { %v307_v43 = vmax.f32 %v301_v39, %v306_v42  ;;  %v314_v44 = vsel %vm305_vm2, %v304_v40, -inf }
  0xbd   : > { %v315_v45 = vmax.f32 %v302_v41, %v314_v44 }
  0xbe   : > { %v308_v46 = vrot.slane %v307_v43, 4 }
  0xbf   : > { %v316_v47 = vrot.slane %v315_v45, 4 }
  0xc0   : > { %v309_v48 = vmax.f32 %v307_v43, %v308_v46 }
  0xc1   : > { %v317_v49 = vmax.f32 %v315_v45, %v316_v47 }
  0xc2   : > { %v310_v50 = vrot.slane %v309_v48, 2 }
  0xc3   : > { %v318_v51 = vrot.slane %v317_v49, 2 }
  0xc4   : > { %v311_v52 = vmax.f32 %v309_v48, %v310_v50 }
  0xc5   : > { %v319_v53 = vmax.f32 %v317_v49, %v318_v51 }
  0xc6   : > { %v312_v54 = vrot.slane %v311_v52, 1 }
  0xc7   : > { %v320_v55 = vrot.slane %v319_v53, 1 }
  0xc8   : > { %v313_v56 = vmax.f32 %v311_v52, %v312_v54 }
  0xc9   : > { %v321_v57 = vmax.f32 %v319_v53, %v320_v55 }
  0xca   : > { %v322_v58 = vsub.f32 %v301_v39, %v313_v56  ;;  %v324_v59 = vsub.f32 %v303_v38, %v313_v56 }
  0xcb   : > { %v323_v60 = vsub.f32 %v302_v41, %v321_v57  ;;  %v325_v61 = vsub.f32 %v304_v40, %v321_v57 }
  0xcc   : > { %v326_v62 = vmul.f32 1.442695, %v322_v58  ;;  %v330_v63 = vmul.f32 1.442695, %v324_v59 }
  0xcd   : > { %v328_v0 = vmul.f32 1.442695, %v323_v60  ;;  %v332_v1 = vmul.f32 1.442695, %v325_v61 }
  0xce   : > { %511 = vpow2.f32 %v326_v62 }
  0xcf   : > { %513 = vpow2.f32 %v330_v63 }
  0xd0   : > { %515 = vpow2.f32 %v328_v0 }
  0xd1   : > { %517 = vpow2.f32 %v332_v1 }
  0xd4   : > { %v512_v2 = vpop.eup %511 }
  0xd5   : > { %v514_v3 = vpop.eup %513 }
  0xd6   : > { %v516_v4 = vpop.eup %515  ;;  %v334_v5 = vsel %vm305_vm2, %v514_v3, 0.0 }
  0xd7   : > { %v518_v6 = vpop.eup %517  ;;  %v335_v7 = vadd.f32 %v512_v2, %v334_v5 }
  0xd8   : > { %v342_v8 = vsel %vm305_vm2, %v518_v6, 0.0 }
  0xd9   : > { %v336_v9 = vrot.slane %v335_v7, 4  ;;  %v343_v10 = vadd.f32 %v516_v4, %v342_v8 }
  0xdb   : > { %v337_v11 = vadd.f32 %v336_v9, %v335_v7  ;;  %v344_v12 = vrot.slane %v343_v10, 4 }
  0xdd   : > { %v338_v13 = vrot.slane %v337_v11, 2  ;;  %v345_v14 = vadd.f32 %v344_v12, %v343_v10 }
  0xdf   : > { %v339_v15 = vadd.f32 %v338_v13, %v337_v11  ;;  %v346_v16 = vrot.slane %v345_v14, 2 }
  0xe1   : > { %v340_v17 = vrot.slane %v339_v15, 1  ;;  %v347_v18 = vadd.f32 %v346_v16, %v345_v14 }
  0xe3   : > { %v341_v19 = vadd.f32 %v340_v17, %v339_v15  ;;  %v348_v20 = vrot.slane %v347_v18, 1 }
  0xe5   : > { %519 = vrcp.f32 %v341_v19  ;;  %v349_v21 = vadd.f32 %v348_v20, %v347_v18 }
  0xe7   : > { %521 = vrcp.f32 %v349_v21 }
  0xeb   : > { %v520_v22 = vpop.eup %519 }
  0xec   : > { %v352_v23 = vmul.f32 %v520_v22, %v512_v2  ;;  %v354_v24 = vmul.f32 %v520_v22, %v514_v3 }
  0xed   : > { %v522_v25 = vpop.eup %521  ;;  %366 = sbr.rel (!%p599_p5) target bundleno = 250 (0xfa), region = 59 }
  0xee   : > { %356 = vst [vmem:[%s202_s18] sm:$0xff] %v352_v23  ;;  %v353_v26 = vmul.f32 %v522_v25, %v516_v4  ;;  %v355_v27 = vmul.f32 %v522_v25, %v518_v6 }
  0xef   : > { %358 = vst [vmem:[%s202_s18 + $0x10] sm:$0x1] %v354_v24 }
  0xf0   : > { %357 = vst [vmem:[%s202_s18 + $0x8] sm:$0xff] %v353_v26 }
  0xf1   : > { %359 = vst [vmem:[%s202_s18 + $0x18] sm:$0x1] %v355_v27 }
  0xf5   : > { %v382_v28 = vld [vmem:[%s202_s18] sm:$0xff] }
  0xf6   : > { %v386_v30 = vld [vmem:[%s202_s18 + $0x10] sm:$0xff]  ;;  %383 = vst [vmem:[%s369_s23] sm:$0xff] %v382_v28 }
  0xf7   : > { %v384_v29 = vld [vmem:[%s202_s18 + $0x8] sm:$0xff]  ;;  %387 = vst [vmem:[%s369_s23 + $0x20] sm:$0xff] %v386_v30 }
  0xf8   : > { %v388_v31 = vld [vmem:[%s202_s18 + $0x18] sm:$0xff]  ;;  %385 = vst [vmem:[%s369_s23 + $0x8] sm:$0xff] %v384_v29 }
  0xf9   : > { %389 = vst [vmem:[%s369_s23 + $0x28] sm:$0xff] %v388_v31 }
  0xfa PF: > { %p10_p10 = scmp.ge.s32.totalorder %s586_s16, 4   ;;  %s654_s12 = smov %s541_s13 }
  0xfb   : > { %s655_s13 = smov %s597_s19  ;;  %s656_s14 = smov %s586_s16 }
  0xfc   :  { %12 = sbr.rel (!%p10_p10) target bundleno = 2 (0x2), region = 113 }

</bundles_post_ra>
